<compile_context>
chip_gen: v6e
topology: v6e:2x2x1
jax: 0.10.0
libtpu: 0.0.40
codegen_flags: <defaults>
</compile_context>

<pallas_src>
import functools

import jax
import jax.numpy as jnp
from jax.experimental import pallas as pl
from jax.experimental.pallas import tpu as pltpu


# ---------------------------------------------------------------------------
# generation-aware VMEM budget & tiling helpers
# ---------------------------------------------------------------------------
def _vmem_capacity_bytes():
    """Physical VMEM per TensorCore (128 MiB v5e/v6e, 64 MiB v7x)."""
    try:
        cap = getattr(pltpu.get_tpu_info(), "vmem_capacity_bytes", None)
        if cap:
            return int(cap)
    except Exception:
        pass
    return 64 * 1024 * 1024            # conservative default (v7x per-TC)


def _vmem_limit(needed_bytes, cap):
    """Scoped-VMEM limit: enough for this kernel, comfortably below physical."""
    hi = int(0.85 * cap)               # ~108 MiB on v5e/v6e, ~54 MiB on v7x
    return int(min(hi, max(32 * 1024 * 1024, needed_bytes + (8 << 20))))


def _b_tile_candidates(B):
    # second-to-last dim of the (bt, C) blocks must be a multiple of 8 or == B
    cands = {B}
    for d in range(8, B, 8):
        if B % d == 0:
            cands.add(d)
    return sorted(cands)


def _l_tile_candidates(L):
    cands = [t for t in range(128, L + 1, 128) if L % t == 0]
    return cands if cands else [L]     # single-tile fallback for odd lengths


def _pick_tiles(B, C, L, itemsize, budget, b_tile=None, l_tile=None):
    """Pick (bt, lt) jointly so the fused apply kernel (double-buffered x input
    + double-buffered output = 4 blocks of bt*C*lt) fits the per-generation
    VMEM budget.  Prefer bt <= B/2 (>=2 programs on the parallel batch axis for
    v7x's two TensorCores) and the largest lane tile up to 2048."""
    margin = 4 << 20
    b_cands = _b_tile_candidates(B)
    l_cands = _l_tile_candidates(L)
    if b_tile is not None and b_tile in b_cands:
        b_cands = [b_tile]
    if l_tile is not None and l_tile in l_cands:
        l_cands = [l_tile]

    def fits(bt, lt):
        return 4 * bt * C * lt * itemsize + 2 * bt * C * 4 + margin <= budget

    best = None
    for bt in b_cands:
        for lt in l_cands:
            if not fits(bt, lt):
                continue
            score = (1 if B // bt >= 2 else 0, min(lt, 2048), bt)
            if best is None or score > best[0]:
                best = (score, bt, lt)
    if best is None:                    # nothing fits: smallest legal tiles
        return min(b_cands), min(l_cands)
    return best[1], best[2]


# ---------------------------------------------------------------------------
# Kernel 1: channel attention   ca = sigmoid(fc(avg_L(x)) + fc(max_L(x)))
# ---------------------------------------------------------------------------
def _channel_attention_kernel(x_ref, w1t_ref, w2t_ref, ca_ref, sum_acc, max_acc,
                              *, total_l):
    l = pl.program_id(1)
    nl = pl.num_programs(1)

    @pl.when(l == 0)
    def _():
        sum_acc[...] = jnp.zeros_like(sum_acc)
        max_acc[...] = jnp.full_like(max_acc, -jnp.inf)

    # Reduce this L tile along the lane axis (XLU has slack; kernel is
    # HBM-bound) and fold into small (bt, C) accumulators -> no vreg spills,
    # negligible scratch.
    xt = x_ref[...].astype(jnp.float32)                     # (bt, C, lt)
    sum_acc[...] = sum_acc[...] + jnp.sum(xt, axis=-1)      # (bt, C)
    max_acc[...] = jnp.maximum(max_acc[...], jnp.max(xt, axis=-1))

    @pl.when(l == nl - 1)
    def _():
        avg = sum_acc[...] * (1.0 / float(total_l))         # static 1/L (no divide)
        mx = max_acc[...]
        w1t = w1t_ref[...].astype(jnp.float32)              # (C, H)
        w2t = w2t_ref[...].astype(jnp.float32)              # (H, C)
        # Fuse the avg- and max- FC chains into a single pair of matmuls.
        v = jnp.concatenate([avg, mx], axis=0)              # (2*bt, C)
        h = jnp.maximum(jnp.dot(v, w1t, preferred_element_type=jnp.float32), 0.0)
        o = jnp.dot(h, w2t, preferred_element_type=jnp.float32)
        bt = ca_ref.shape[0]
        ca_ref[...] = jax.nn.sigmoid(o[:bt] + o[bt:]).astype(ca_ref.dtype)


def channel_attention(x, w1, w2, *, bt, lt, cap):
    """x: (B, C, L); w1: (H, C, 1); w2: (C, H, 1) PyTorch Conv1d weights -> (B, C)."""
    B, C, L = x.shape
    H = w1.shape[0]

    # Glue: drop the trailing kernel-size-1 dim, pre-transpose for row-major matmuls.
    w1t = jnp.transpose(w1[:, :, 0], (1, 0))   # (C, H)
    w2t = jnp.transpose(w2[:, :, 0], (1, 0))   # (H, C)

    kernel = functools.partial(_channel_attention_kernel, total_l=L)
    itemsize = x.dtype.itemsize
    needed = (2 * bt * C * lt * itemsize            # double-buffered x blocks
              + 2 * 2 * C * H * w1t.dtype.itemsize  # resident weights (x2 buffers)
              + 2 * bt * C * itemsize               # ca output
              + 2 * bt * C * 4)                     # (bt, C) f32 scratch x2

    return pl.pallas_call(
        kernel,
        out_shape=jax.ShapeDtypeStruct((B, C), x.dtype),
        grid_spec=pltpu.PrefetchScalarGridSpec(
            num_scalar_prefetch=0,
            grid=(B // bt, L // lt),
            in_specs=[
                pl.BlockSpec((bt, C, lt), lambda b, l: (b, 0, l)),
                pl.BlockSpec((C, H), lambda b, l: (0, 0)),   # resident weights
                pl.BlockSpec((H, C), lambda b, l: (0, 0)),
            ],
            out_specs=pl.BlockSpec((bt, C), lambda b, l: (b, 0)),
            scratch_shapes=[
                pltpu.VMEM((bt, C), jnp.float32),   # running sum
                pltpu.VMEM((bt, C), jnp.float32),   # running max
            ],
        ),
        compiler_params=pltpu.CompilerParams(
            dimension_semantics=("parallel", "arbitrary"),
            vmem_limit_bytes=_vmem_limit(needed, cap)),
        cost_estimate=pl.CostEstimate(
            flops=2 * B * C * L + 8 * B * C * H,
            transcendentals=B * C,
            bytes_accessed=itemsize * B * C * L + itemsize * B * C + 8 * C * H),
    )(x, w1t, w2t)


# ---------------------------------------------------------------------------
# Kernel 2 (fused): apply channel attention, channel pooling, k-tap spatial
# conv (halo from a tiny side array), sigmoid, final apply.
# ---------------------------------------------------------------------------
def _apply_cbam_kernel(x_ref, ca_ref, halo_ref, wsa_ref, out_ref, *, ks, inv_c):
    x = x_ref[...].astype(jnp.float32)            # (bt, C, lt)
    ca = ca_ref[...].astype(jnp.float32)          # (bt, C)
    out1 = x * ca[:, :, None]                     # x * channel attention

    # channel pooling for spatial attention (sublane reduce, free slack)
    p_avg = jnp.sum(out1, axis=1) * inv_c         # (bt, lt)
    p_max = jnp.max(out1, axis=1)                 # (bt, lt)

    # tiny halo: pooled values pad columns to the left/right of this L tile
    halo = halo_ref[0].astype(jnp.float32)        # (2 chan, 2 side, bt, pad)
    lt = x.shape[2]
    avg_ext = jnp.concatenate([halo[0, 0], p_avg, halo[0, 1]], axis=-1)  # (bt, lt+2*pad)
    max_ext = jnp.concatenate([halo[1, 0], p_max, halo[1, 1]], axis=-1)

    acc = jnp.zeros((x.shape[0], lt), jnp.float32)
    for k in range(ks):                           # Conv1d(2, 1, ks, pad=(ks-1)//2)
        acc = acc + wsa_ref[0, k] * avg_ext[:, k:k + lt] \
                  + wsa_ref[1, k] * max_ext[:, k:k + lt]
    sa = jax.nn.sigmoid(acc)                      # (bt, lt)

    out_ref[...] = (out1 * sa[:, None, :]).astype(out_ref.dtype)


def apply_cbam(x, ca, halo, wsa2d, *, bt, lt, cap):
    B, C, L = x.shape
    ks = wsa2d.shape[-1]
    pad = (ks - 1) // 2
    nl = L // lt
    itemsize = x.dtype.itemsize

    kernel = functools.partial(_apply_cbam_kernel, ks=ks, inv_c=1.0 / float(C))
    needed = (4 * bt * C * lt * itemsize          # x in + out, double-buffered
              + 2 * bt * C * itemsize             # ca
              + 2 * 2 * 2 * bt * pad * 4)         # halo

    return pl.pallas_call(
        kernel,
        out_shape=jax.ShapeDtypeStruct((B, C, L), x.dtype),
        grid_spec=pltpu.PrefetchScalarGridSpec(
            num_scalar_prefetch=0,
            grid=(B // bt, nl),
            in_specs=[
                pl.BlockSpec((bt, C, lt), lambda b, l: (b, 0, l)),
                pl.BlockSpec((bt, C), lambda b, l: (b, 0)),
                pl.BlockSpec((1, 2, 2, bt, pad), lambda b, l: (l, 0, 0, b, 0)),
                pl.BlockSpec(memory_space=pltpu.MemorySpace.SMEM),   # (2, ks) scalars
            ],
            out_specs=pl.BlockSpec((bt, C, lt), lambda b, l: (b, 0, l)),
        ),
        compiler_params=pltpu.CompilerParams(
            dimension_semantics=("parallel", "parallel"),
            vmem_limit_bytes=_vmem_limit(needed, cap)),
        cost_estimate=pl.CostEstimate(
            flops=4 * B * C * L + 4 * ks * B * L,
            transcendentals=B * L,
            bytes_accessed=2 * itemsize * B * C * L + itemsize * B * C),
    )(x, ca, halo, wsa2d)


# ---------------------------------------------------------------------------
# wrapper-side halo for the spatial conv (tiny: pad columns per tile boundary)
# ---------------------------------------------------------------------------
def _make_halo(x, ca, lt, pad):
    """pooled (avg/max over C of x*ca) at the pad columns just outside each
    L tile; zeros at the global edges (the conv zero-pads).  Shape
    (nl, 2 chan[avg,max], 2 side[left,right], B, pad)."""
    B, C, L = x.shape
    nl = L // lt
    ca_b = ca.astype(jnp.float32)[:, :, None]
    zeros = jnp.zeros((2, B, pad), jnp.float32)

    def pooled_cols(lo, hi):
        cols = x[:, :, lo:hi].astype(jnp.float32) * ca_b
        return jnp.stack([jnp.mean(cols, axis=1), jnp.max(cols, axis=1)], axis=0)

    halos = []
    for l in range(nl):
        lo, hi = l * lt, (l + 1) * lt
        left = pooled_cols(lo - pad, lo) if l > 0 else zeros
        right = pooled_cols(hi, hi + pad) if l < nl - 1 else zeros
        halos.append(jnp.stack([left, right], axis=1))      # (2, 2, B, pad)
    return jnp.stack(halos, axis=0)                          # (nl, 2, 2, B, pad)


# ---------------------------------------------------------------------------
# CBAM forward: out = x * channel_attention(x);  out = out * spatial_attention(out)
# ---------------------------------------------------------------------------
def cbam(x, w1, w2, w_sa, *, b_tile=None, l_tile=None):
    """x: (B, C, L); w1: (H, C, 1); w2: (C, H, 1); w_sa: (1, 2, KS)."""
    B, C, L = x.shape
    ks = w_sa.shape[-1]
    pad = (ks - 1) // 2
    assert pad >= 1, "spatial kernel_size must be an odd value >= 3"

    cap = _vmem_capacity_bytes()
    budget = int(0.75 * cap)            # ~96 MiB on v5e/v6e, ~48 MiB on v7x
    bt, lt = _pick_tiles(B, C, L, x.dtype.itemsize, budget, b_tile, l_tile)

    ca = channel_attention(x, w1, w2, bt=bt, lt=lt, cap=cap)      # (B, C)

    # Layout plumbing only: tiny per-tile halo of the pooled map so the fused
    # kernel can run the 7-tap conv without re-reading neighbouring tiles.
    halo = _make_halo(x, ca, lt, pad)                              # (nl, 2, 2, B, pad)
    wsa2d = w_sa[0].astype(jnp.float32)                            # (2, KS)

    return apply_cbam(x, ca, halo, wsa2d, bt=bt, lt=lt, cap=cap)


# ---------------------------------------------------------------------------
# Pure-JAX reference matching the PyTorch CBAM forward exactly.
# ---------------------------------------------------------------------------
def cbam_ref(x, w1, w2, w_sa):
    avg = jnp.mean(x, axis=-1)                    # (B, C)
    mx = jnp.max(x, axis=-1)                      # (B, C)
    w1m = w1[:, :, 0]                             # (H, C)
    w2m = w2[:, :, 0]                             # (C, H)

    def fc(v):
        return jnp.maximum(v @ w1m.T, 0.0) @ w2m.T

    ca = jax.nn.sigmoid(fc(avg) + fc(mx))[:, :, None]     # (B, C, 1)
    out1 = x * ca
    p = jnp.concatenate([jnp.mean(out1, axis=1, keepdims=True),
                         jnp.max(out1, axis=1, keepdims=True)], axis=1)  # (B, 2, L)
    pad = (w_sa.shape[-1] - 1) // 2
    sa_pre = jax.lax.conv_general_dilated(
        p, w_sa, window_strides=(1,), padding=((pad, pad),),
        dimension_numbers=("NCH", "OIH", "NCH"))           # (B, 1, L)
    return out1 * jax.nn.sigmoid(sa_pre)


if __name__ == "__main__":
    # Small shapes consistent with the module: the fc squeeze divisor is
    # hardcoded to 16, so C must be a multiple of 16.  L=256 with l_tile=128
    # exercises the multi-L-tile accumulation + conv-halo path.
    B, C, L = 4, 64, 256
    H = C // 16
    KS = 7

    key = jax.random.PRNGKey(0)
    kx, k1, k2, k3 = jax.random.split(key, 4)
    x = jax.random.normal(kx, (B, C, L), dtype=jnp.float32)
    # Deterministic synthetic Conv1d weights (no bias), PyTorch layouts.
    w1 = jax.random.normal(k1, (H, C, 1), dtype=jnp.float32) * (1.0 / jnp.sqrt(C))
    w2 = jax.random.normal(k2, (C, H, 1), dtype=jnp.float32) * (1.0 / jnp.sqrt(H))
    w_sa = jax.random.normal(k3, (1, 2, KS), dtype=jnp.float32) * (1.0 / jnp.sqrt(2.0 * KS))

    ref = jax.block_until_ready(cbam_ref(x, w1, w2, w_sa))

    # Multi-L-tile path (K1 accumulation + in-kernel conv with halos).
    out_tiled = jax.block_until_ready(cbam(x, w1, w2, w_sa, l_tile=128))
    assert out_tiled.shape == (B, C, L), out_tiled.shape
    assert jnp.allclose(out_tiled, ref, atol=1e-4, rtol=1e-4), \
        float(jnp.max(jnp.abs(out_tiled - ref)))

    # Auto-tiled path (single L tile, zero halos).
    out_auto = jax.block_until_ready(cbam(x, w1, w2, w_sa))
    assert jnp.allclose(out_auto, ref, atol=1e-4, rtol=1e-4), \
        float(jnp.max(jnp.abs(out_auto - ref)))

    print("KERNEL_OK")
</pallas_src>

<mosaic_0001>
module attributes {stable_mosaic.version = 11 : i64} {
  func.func @_channel_attention_kernel(%arg0: i32, %arg1: i32, %arg2: memref<4x64x128xf32, #tpu.memory_space<vmem>>, %arg3: memref<64x4xf32, #tpu.memory_space<vmem>>, %arg4: memref<4x64xf32, #tpu.memory_space<vmem>>, %arg5: memref<4x64xf32, #tpu.memory_space<vmem>>, %arg6: memref<4x64xf32, #tpu.memory_space<vmem>>, %arg7: memref<4x64xf32, #tpu.memory_space<vmem>>) attributes {dimension_semantics = [#tpu.dimension_semantics<parallel>, #tpu.dimension_semantics<arbitrary>], iteration_bounds = array<i64: 1, 2>, scalar_prefetch = 0 : i64, scratch_operands = 2 : i64, tpu.core_type = #tpu.core_type<tc>, window_params = [{transform_indices = @transform_0, window_bounds = array<i64: 4, 64, 128>}, {pipeline_mode = #tpu.pipeline_mode<synchronous>, transform_indices = @transform_1, window_bounds = array<i64: 64, 4>}, {pipeline_mode = #tpu.pipeline_mode<synchronous>, transform_indices = @transform_2, window_bounds = array<i64: 4, 64>}, {transform_indices = @transform_3, window_bounds = array<i64: 4, 64>}]} {
    %c0_i32 = arith.constant 0 : i32
    %0 = arith.cmpi eq, %arg1, %c0_i32 : i32
    %1 = arith.extui %0 : i1 to i32
    %c0_i32_0 = arith.constant 0 : i32
    %2 = arith.cmpi ne, %1, %c0_i32_0 : i32
    scf.if %2 {
      %cst_13 = arith.constant 0.000000e+00 : f32
      %15 = vector.broadcast %cst_13 : f32 to vector<4x64xf32>
      %c0_14 = arith.constant 0 : index
      %c0_15 = arith.constant 0 : index
      %16 = vector.load %arg6[%c0_14, %c0_15] : memref<4x64xf32, #tpu.memory_space<vmem>>, vector<4x64xf32>
      tpu.vector_store %arg6[%c0_14, %c0_15], %15 {strides = array<i32>} : memref<4x64xf32, #tpu.memory_space<vmem>>, vector<4x64xf32>,
      %cst_16 = arith.constant 0xFF800000 : f32
      %17 = vector.broadcast %cst_16 : f32 to vector<4x64xf32>
      %c0_17 = arith.constant 0 : index
      %c0_18 = arith.constant 0 : index
      %18 = vector.load %arg7[%c0_17, %c0_18] : memref<4x64xf32, #tpu.memory_space<vmem>>, vector<4x64xf32>
      tpu.vector_store %arg7[%c0_17, %c0_18], %17 {strides = array<i32>} : memref<4x64xf32, #tpu.memory_space<vmem>>, vector<4x64xf32>,
    } else {
    }
    %c0 = arith.constant 0 : index
    %c0_1 = arith.constant 0 : index
    %c0_2 = arith.constant 0 : index
    %3 = vector.load %arg2[%c0, %c0_1, %c0_2] : memref<4x64x128xf32, #tpu.memory_space<vmem>>, vector<4x64x128xf32>
    %c0_3 = arith.constant 0 : index
    %c0_4 = arith.constant 0 : index
    %4 = vector.load %arg6[%c0_3, %c0_4] : memref<4x64xf32, #tpu.memory_space<vmem>>, vector<4x64xf32>
    %cst = arith.constant dense<0.000000e+00> : vector<4x64xf32>
    %5 = vector.multi_reduction <add>, %3, %cst [2] : vector<4x64x128xf32> to vector<4x64xf32>
    %6 = arith.addf %4, %5 : vector<4x64xf32>
    %c0_5 = arith.constant 0 : index
    %c0_6 = arith.constant 0 : index
    %7 = vector.load %arg6[%c0_5, %c0_6] : memref<4x64xf32, #tpu.memory_space<vmem>>, vector<4x64xf32>
    tpu.vector_store %arg6[%c0_5, %c0_6], %6 {strides = array<i32>} : memref<4x64xf32, #tpu.memory_space<vmem>>, vector<4x64xf32>,
    %c0_7 = arith.constant 0 : index
    %c0_8 = arith.constant 0 : index
    %8 = vector.load %arg7[%c0_7, %c0_8] : memref<4x64xf32, #tpu.memory_space<vmem>>, vector<4x64xf32>
    %cst_9 = arith.constant dense<0xFF800000> : vector<4x64xf32>
    %9 = vector.multi_reduction <maximumf>, %3, %cst_9 [2] : vector<4x64x128xf32> to vector<4x64xf32>
    %10 = arith.maximumf %8, %9 : vector<4x64xf32>
    %c0_10 = arith.constant 0 : index
    %c0_11 = arith.constant 0 : index
    %11 = vector.load %arg7[%c0_10, %c0_11] : memref<4x64xf32, #tpu.memory_space<vmem>>, vector<4x64xf32>
    tpu.vector_store %arg7[%c0_10, %c0_11], %10 {strides = array<i32>} : memref<4x64xf32, #tpu.memory_space<vmem>>, vector<4x64xf32>,
    %c1_i32 = arith.constant 1 : i32
    %12 = arith.cmpi eq, %arg1, %c1_i32 : i32
    %13 = arith.extui %12 : i1 to i32
    %c0_i32_12 = arith.constant 0 : i32
    %14 = arith.cmpi ne, %13, %c0_i32_12 : i32
    scf.if %14 {
      %c0_13 = arith.constant 0 : index
      %c0_14 = arith.constant 0 : index
      %15 = vector.load %arg6[%c0_13, %c0_14] : memref<4x64xf32, #tpu.memory_space<vmem>>, vector<4x64xf32>
      %cst_15 = arith.constant 3.906250e-03 : f32
      %16 = vector.broadcast %cst_15 : f32 to vector<4x64xf32>
      %17 = arith.mulf %15, %16 : vector<4x64xf32>
      %c0_16 = arith.constant 0 : index
      %c0_17 = arith.constant 0 : index
      %18 = vector.load %arg7[%c0_16, %c0_17] : memref<4x64xf32, #tpu.memory_space<vmem>>, vector<4x64xf32>
      %c0_18 = arith.constant 0 : index
      %c0_19 = arith.constant 0 : index
      %19 = vector.load %arg3[%c0_18, %c0_19] : memref<64x4xf32, #tpu.memory_space<vmem>>, vector<64x4xf32>
      %c0_20 = arith.constant 0 : index
      %c0_21 = arith.constant 0 : index
      %20 = vector.load %arg4[%c0_20, %c0_21] : memref<4x64xf32, #tpu.memory_space<vmem>>, vector<4x64xf32>
      %21 = tpu.concatenate %17, %18 in 0 : vector<4x64xf32>, vector<4x64xf32> -> vector<8x64xf32>
      %cst_22 = arith.constant dense<0.000000e+00> : vector<8x4xf32>
      %22 = tpu.matmul %21, %19, %cst_22 {dimension_numbers = #tpu.dot_dimension_numbers<[1], [0], [0], [1], [0, 0, 1, 1], [], []>} : vector<8x64xf32>, vector<64x4xf32>, vector<8x4xf32> -> vector<8x4xf32>
      %cst_23 = arith.constant 0.000000e+00 : f32
      %23 = vector.broadcast %cst_23 : f32 to vector<8x4xf32>
      %24 = arith.maximumf %22, %23 : vector<8x4xf32>
      %cst_24 = arith.constant dense<0.000000e+00> : vector<8x64xf32>
      %25 = tpu.matmul %24, %20, %cst_24 {dimension_numbers = #tpu.dot_dimension_numbers<[1], [0], [0], [1], [0, 0, 1, 1], [], []>} : vector<8x4xf32>, vector<4x64xf32>, vector<8x64xf32> -> vector<8x64xf32>
      %26 = vector.extract_strided_slice %25 {offsets = [0, 0], sizes = [4, 64], strides = [1, 1]} : vector<8x64xf32> to vector<4x64xf32>
      %27 = vector.extract_strided_slice %25 {offsets = [4, 0], sizes = [4, 64], strides = [1, 1]} : vector<8x64xf32> to vector<4x64xf32>
      %28 = arith.addf %26, %27 : vector<4x64xf32>
      %29 = arith.negf %28 : vector<4x64xf32>
      %30 = math.exp %29 : vector<4x64xf32>
      %cst_25 = arith.constant 1.000000e+00 : f32
      %31 = vector.broadcast %cst_25 : f32 to vector<4x64xf32>
      %32 = arith.addf %31, %30 : vector<4x64xf32>
      %33 = arith.divf %31, %32 : vector<4x64xf32>
      %c0_26 = arith.constant 0 : index
      %c0_27 = arith.constant 0 : index
      %34 = vector.load %arg5[%c0_26, %c0_27] : memref<4x64xf32, #tpu.memory_space<vmem>>, vector<4x64xf32>
      tpu.vector_store %arg5[%c0_26, %c0_27], %33 {strides = array<i32>} : memref<4x64xf32, #tpu.memory_space<vmem>>, vector<4x64xf32>,
    } else {
    }
    return
  }
  func.func @transform_0(%arg0: i32, %arg1: i32) -> (i32, i32, i32) {
    %c0_i32 = arith.constant 0 : i32
    %c0_i32_0 = arith.constant 0 : i32
    return %arg0, %c0_i32, %arg1 : i32, i32, i32
  }
  func.func @transform_1(%arg0: i32, %arg1: i32) -> (i32, i32) {
    %c0_i32 = arith.constant 0 : i32
    %c0_i32_0 = arith.constant 0 : i32
    %c0_i32_1 = arith.constant 0 : i32
    return %c0_i32, %c0_i32_0 : i32, i32
  }
  func.func @transform_2(%arg0: i32, %arg1: i32) -> (i32, i32) {
    %c0_i32 = arith.constant 0 : i32
    %c0_i32_0 = arith.constant 0 : i32
    %c0_i32_1 = arith.constant 0 : i32
    return %c0_i32, %c0_i32_0 : i32, i32
  }
  func.func @transform_3(%arg0: i32, %arg1: i32) -> (i32, i32) {
    %c0_i32 = arith.constant 0 : i32
    %c0_i32_0 = arith.constant 0 : i32
    return %arg0, %c0_i32 : i32, i32
  }
}

</mosaic_0001>

<bundles_post_ra>
// kernel: tpu_custom_call.1
= control target key start
LH: loop header
LB: loop body
LE: loop exit
PB: predicated region body
PF: predicated region fallthrough
CT: control target
= control target key end

     0   :  { %8 = vsyncpa [#allocation5], 0  ;;  %s1657_s0 = inlined_call_operand.hbm [shape: f32[4,64,256], index: 0, kind: input, shape index: {}]   ;;  %s1658_s1 = inlined_call_operand.vmem [shape: f32[64,4], index: 1, kind: input, shape index: {}]   ;;  %s1659_s2 = inlined_call_operand.vmem [shape: f32[4,64], index: 2, kind: input, shape index: {}]   ;;  %s1660_s3 = inlined_call_operand.hbm [shape: f32[4,64], index: 3, kind: output, shape index: {}]  }
   0x1   :  { %10 = vsyncpa [#allocation5 + $0x1], 0 }
   0x2   :  { %11 = vsyncpa [#allocation6], 0  ;;  %s1294_s12 = smov 0   ;;  %s1296_s13 = smov 0  }
   0x3   :  { %s1298_s14 = smov 0   ;;  %s1300_s15 = smov 0  }
   0x4   :  { %s1302_s16 = smov 0   ;;  %s1304_s17 = smov 0  }
   0x5 LB: > { %s1032_s18 = sadd.s32 4294967295, %s1263_s17   ;;  %s26_s19 = sadd.s32 1, %s1259_s16  ;;  %s1263_s17 = sphi %s1304_s17, %s17_s17   ;;  %s1259_s16 = sphi %s1302_s16, %s1669_s16   ;;  %s1255_s15 = sphi %s1300_s15, %s1668_s15   ;;  %s1251_s14 = sphi %s1298_s14, %s1667_s14   ;;  %s1247_s13 = sphi %s1296_s13, %s1666_s13   ;;  %s1243_s12 = sphi %s1294_s12, %s1665_s12  }
   0x6   : > { %p27_p0 = scmp.ge.s32.totalorder %s26_s19, 2  ;;  %s38_s20 = sadd.s32 1, %s1251_s14 }
   0x7   : > { %p45_p1 = scmp.ne.s32.totalorder %s1251_s14, %s1247_s13  ;;  %p46_p2 = scmp.eq.s32.totalorder %s1263_s17, 0 }
   0x8   : > { %s1671_s19 = smov (%p27_p0, %s26_s19), 0  ;;  %p51_p4 = scmp.ne.s32.totalorder %s1247_s13, %s1243_s12 }
   0x9   : > { %p1330_p3 = por %p46_p2, %p45_p1  ;;  %s34_s22 = ssub.s32 %s1259_s16, %s1671_s19 }
   0xa   : > { %p52_p5 = scmp.eq.s32.totalorder %s1032_s18, 0  ;;  %p36_p6 = scmp.eq.s32.totalorder %s34_s22, 0 }
   0xb   : > { %p1094_p8 = scmp.lt.s32.totalorder %s1263_s17, 2  ;;  %s149_s25 = sand.u32 1, %s1251_s14  }
   0xc   : > { %p1339_p7 = por %p52_p5, %p51_p4  ;;  %s1036_s26 = sshll.u32 %s1259_s16, 7 }
   0xd   : > { %s1345_s24 = scalar_select %p36_p6, %s1251_s14, %s38_s20  }
   0xe   : > { %s1035_s27 = sshll.u32 %s149_s25, 8  ;;  %s161_s30 = scalar_lea.hbm %s1657_s0, %s1036_s26 }
   0xf   : > { %s153_s4 = scalar_lea.vmem [#allocation4], %s1035_s27  ;;  %p1354_p9 = pnand %p1094_p8, %p1330_p3 }
  0x10   : > { %s162_s5 = sshll.u32 %s153_s4, 4  ;;  %p1037_p10 = scmp.ge.s32.totalorder %s1263_s17, 1  ;;  %s163_s5 = int_to_ptr.vmem [resolvable:$true] %s162_s5 }
  0x11   : > { %s150_s7 = scalar_lea.sflag [#allocation5], %s149_s25  ;;  %p1159_p11 = pneg %p1354_p9 }
  0x12   : > { %s1170_s8 = scalar_lea.vmem %s163_s5, 4096  ;;  %s1265_s9 = smov [#allocation4]  }
  0x13   : > { %p1171_p12 = scmp.ne.s32.totalorder %s163_s5, %s1170_s8  ;;  %s1175_s10 = sshll.u32 %s1265_s9, 4  ;;  %s1176_s10 = int_to_ptr.vmem [resolvable:$false] %s1175_s10 }
  0x14   : > { %s1177_s11 = scalar_lea.vmem %s1176_s10, 8192  ;;  %p1178_p1 = scmp.lt.s32.totalorder %s163_s5, %s1176_s10 }
  0x15   : > { %p1173_p13 = pnand %p1171_p12, %p1159_p11  ;;  %p1179_p2 = scmp.lt.s32.totalorder %s1177_s11, %s1170_s8 }
  0x17   : > { %p1174_p0 = pneg %p1173_p13  ;;  %p1180_p3 = por %p1179_p2, %p1178_p1 }
  0x19   : > { %p1181_p4 = pnand %p1180_p3, %p1174_p0 }
  0x1b   : > { %1184 = shalt.err (!%p1181_p4)
}
  0x1c   : > { %s1266_s12 = smov 256   ;;  %s1267_s20 = smov 128  }
  0x1d   : > { %s1268_s21 = smov 8   ;;  %p170_p5 = scmp.lt.s32.totalorder %s1263_s17, 3 }
  0x1e   : > { %1093 = dma.hbm_to_vmem [thread:$0]  (!%p1354_p9), %s161_s30, 4096, %s163_s5, %s150_s7, %s1266_s12, %s1267_s20, %s1268_s21  }
  0x1f   : > { %p171_p6 = pnand %p1037_p10, %p170_p5 }
  0x20   : > { %s176_s22 = sand.u32 (!%p171_p6), 1, %s1247_s13  }
  0x21   : > { %174 = sbr.rel (%p171_p6) target bundleno = 775 (0x307), region = 32  ;;  %s1038_s25 = sshll.u32 (!%p171_p6), %s176_s22, 8 }
  0x22   : > { %s177_s26 = scalar_lea.sflag (!%p171_p6), [#allocation5], %s176_s22  ;;  %s1367_s27 = scalar_lea.vmem (!%p171_p6), [#allocation4], %s1038_s25 }
  0x26   : > { %1234 = dma.done.wait (%p1339_p7), %s177_s26, 4096  }
  0x27   : > { %1236 = vsyncadd (%p1339_p7), %s177_s26, 4294963200  ;;  %p1039_p8 = scmp.ne.s32.totalorder %s1255_s15, 0 }
  0x29   : > { %202 = sbr.rel (%p1039_p8) target bundleno = 48 (0x30), region = 40 }
  0x2e   : > { %vm203_vm0 = vcmask 519168   ;;  %v1269_v0 = vmov 0.0   ;;  %v1270_v1 = vmov -inf  }
  0x2f   : > { %204 = vst.msk [vmem:[#allocation2] sm:$0xf] %vm203_vm0, %v1269_v0  ;;  %205 = vst.msk [vmem:[#allocation3] sm:$0xf] %vm203_vm0, %v1270_v1 }
  0x30 PF: > { %v208_v2 = vld [vmem:[%s1367_s27 + $0x10] sm:$0xff]  ;;  %v206_v3 = vld [vmem:[%s1367_s27] sm:$0xff]  ;;  %v209_v4 = vld [vmem:[%s1367_s27 + $0x18] sm:$0xff]  ;;  %v335_v34 = vlaneseq  ;;  %vm346_vm1 = vcmask 130112   ;;  %vm353_vm2 = vcmask 195712   ;;  %vm360_vm3 = vcmask 261312  }
  0x31   : > { %243 = vadd.xlane.f32.xlu1 %v208_v2  ;;  %239 = vadd.xlane.f32.xlu0 %v206_v3  ;;  %v207_v5 = vld [vmem:[%s1367_s27 + $0x8] sm:$0xff]  ;;  %v210_v7 = vld [vmem:[%s1367_s27 + $0x20] sm:$0xff]  ;;  %v1381_v8 = vld [vmem:[%s1367_s27 + $0x38] sm:$0xff]  ;;  %vm367_vm4 = vcmask 326912   ;;  %vm374_vm5 = vcmask 392512   ;;  %vm381_vm6 = vcmask 458112  }
  0x32   : > { %v211_v6 = vld [vmem:[%s1367_s27 + $0x28] sm:$0xff]  ;;  %v212_v9 = vld [vmem:[%s1367_s27 + $0x30] sm:$0xff]  ;;  %v214_v11 = vld [vmem:[%s1367_s27 + $0x40] sm:$0xff]  ;;  %v336_v35 = vand.u32 127, %v335_v34  ;;  %v338_v36 = vshrl.u32 %v335_v34, 7  ;;  %vm388_vm7 = vcmask 523712  }
  0x33   : > { %v215_v10 = vld [vmem:[%s1367_s27 + $0x48] sm:$0xff]  ;;  %v217_v12 = vld [vmem:[%s1367_s27 + $0x58] sm:$0xff]  ;;  %v216_v13 = vld [vmem:[%s1367_s27 + $0x50] sm:$0xff]  ;;  %vm507_vm8 = vcmask 1041409   ;;  %vm509_vm9 = vcmask 1042434   ;;  %vm511_vm10 = vcmask 1043459  }
  0x34   : > { %v219_v14 = vld [vmem:[%s1367_s27 + $0x68] sm:$0xff]  ;;  %v218_v15 = vld [vmem:[%s1367_s27 + $0x60] sm:$0xff]  ;;  %v221_v16 = vld [vmem:[%s1367_s27 + $0x78] sm:$0xff]  ;;  %v341_v37 = vadd.s32 4294967288, %v336_v35  ;;  %v348_v38 = vadd.s32 4294967280, %v336_v35  ;;  %v355_v39 = vadd.s32 4294967272, %v336_v35  ;;  %v1410_v43 = vsub.s32 %v336_v35, %v338_v36 }
  0x35   : > { %245 = vadd.xlane.f32.xlu1 %v209_v4  ;;  %241 = vadd.xlane.f32.xlu0 %v207_v5  ;;  %v220_v17 = vld [vmem:[%s1367_s27 + $0x70] sm:$0xff]  ;;  %v223_v18 = vld [vmem:[%s1367_s27 + $0x88] sm:$0xff]  ;;  %v222_v19 = vld [vmem:[%s1367_s27 + $0x80] sm:$0xff]  ;;  %v369_v42 = vadd.s32 4294967256, %v336_v35  ;;  %v362_v45 = vadd.s32 4294967264, %v336_v35  ;;  %v383_v51 = vadd.s32 4294967240, %v336_v35 }
  0x36   : > { %v225_v20 = vld [vmem:[%s1367_s27 + $0x98] sm:$0xff]  ;;  %v224_v21 = vld [vmem:[%s1367_s27 + $0x90] sm:$0xff]  ;;  %v227_v22 = vld [vmem:[%s1367_s27 + $0xa8] sm:$0xff]  ;;  %v1412_v44 = vsub.s32 %v341_v37, %v338_v36  ;;  %v1414_v46 = vsub.s32 %v348_v38, %v338_v36  ;;  %v1416_v47 = vsub.s32 %v355_v39, %v338_v36  ;;  %v376_v55 = vadd.s32 4294967248, %v336_v35  ;;  %p1040_p7 = scmp.ne.s32.totalorder %s1255_s15, 1 }
  0x37   : > { %v226_v23 = vld [vmem:[%s1367_s27 + $0xa0] sm:$0xff]  ;;  %v231_v24 = vld [vmem:[%s1367_s27 + $0xc8] sm:$0xff]  ;;  %v232_v26 = vld [vmem:[%s1367_s27 + $0xd0] sm:$0xff]  ;;  %v1418_v50 = vsub.s32 %v369_v42, %v338_v36  ;;  %v1422_v54 = vsub.s32 %v362_v45, %v338_v36  ;;  %v1428_v62 = vsub.s32 %v383_v51, %v338_v36  ;;  %vm515_vm11 = vcmask 519168  }
  0x38   : > { %v230_v25 = vld [vmem:[%s1367_s27 + $0xc0] sm:$0xff]  ;;  %v233_v27 = vld [vmem:[%s1367_s27 + $0xd8] sm:$0xff]  ;;  %v235_v29 = vld [vmem:[%s1367_s27 + $0xe8] sm:$0xff] }
  0x39   : > { %249 = vadd.xlane.f32.xlu1 %v211_v6  ;;  %247 = vadd.xlane.f32.xlu0 %v210_v7  ;;  %v234_v28 = vld [vmem:[%s1367_s27 + $0xe0] sm:$0xff]  ;;  %v228_v30 = vld [vmem:[%s1367_s27 + $0xb0] sm:$0xff]  ;;  %v229_v32 = vld [vmem:[%s1367_s27 + $0xb8] sm:$0xff] }
  0x3a   : > { %v236_v31 = vld [vmem:[%s1367_s27 + $0xf0] sm:$0xff]  ;;  %v237_v33 = vld [vmem:[%s1367_s27 + $0xf8] sm:$0xff] }
  0x3d   : > { %253 = vadd.xlane.f32.xlu1 %v1381_v8  ;;  %251 = vadd.xlane.f32.xlu0 %v212_v9 }
  0x41   : > { %257 = vadd.xlane.f32.xlu1 %v215_v10  ;;  %255 = vadd.xlane.f32.xlu0 %v214_v11 }
  0x45   : > { %261 = vadd.xlane.f32.xlu1 %v217_v12  ;;  %259 = vadd.xlane.f32.xlu0 %v216_v13 }
  0x49   : > { %265 = vadd.xlane.f32.xlu1 %v219_v14  ;;  %263 = vadd.xlane.f32.xlu0 %v218_v15 }
  0x4d   : > { %269 = vadd.xlane.f32.xlu1 %v221_v16  ;;  %267 = vadd.xlane.f32.xlu0 %v220_v17 }
  0x51   : > { %273 = vadd.xlane.f32.xlu1 %v223_v18  ;;  %271 = vadd.xlane.f32.xlu0 %v222_v19 }
  0x55   : > { %277 = vadd.xlane.f32.xlu1 %v225_v20  ;;  %275 = vadd.xlane.f32.xlu0 %v224_v21 }
  0x59   : > { %281 = vadd.xlane.f32.xlu1 %v227_v22  ;;  %279 = vadd.xlane.f32.xlu0 %v226_v23 }
  0x5d   : > { %520 = vmax.xlane.f32.xlu1 %v207_v5  ;;  %518 = vmax.xlane.f32.xlu0 %v206_v3 }
  0x61   : > { %536 = vmax.xlane.f32.xlu1 %v215_v10  ;;  %534 = vmax.xlane.f32.xlu0 %v214_v11 }
  0x65   : > { %538 = vmax.xlane.f32.xlu1 %v216_v13  ;;  %522 = vmax.xlane.f32.xlu0 %v208_v2  ;;  %v1433_v2 = vsub.s32 %v376_v55, %v338_v36 }
  0x69   : > { %552 = vmax.xlane.f32.xlu1 %v223_v18  ;;  %550 = vmax.xlane.f32.xlu0 %v222_v19 }
  0x6d   : > { %289 = vadd.xlane.f32.xlu1 %v231_v24  ;;  %287 = vadd.xlane.f32.xlu0 %v230_v25 }
  0x71   : > { %540 = vmax.xlane.f32.xlu1 %v217_v12  ;;  %524 = vmax.xlane.f32.xlu0 %v209_v4 }
  0x75   : > { %566 = vmax.xlane.f32.xlu1 %v230_v25  ;;  %554 = vmax.xlane.f32.xlu0 %v224_v21 }
  0x79   : > { %291 = vadd.xlane.f32.xlu1 %v232_v26  ;;  %568 = vmax.xlane.f32.xlu0 %v231_v24 }
  0x7d   : > { %542 = vmax.xlane.f32.xlu1 %v218_v15  ;;  %526 = vmax.xlane.f32.xlu0 %v210_v7 }
  0x81   : > { %570 = vmax.xlane.f32.xlu1 %v232_v26  ;;  %556 = vmax.xlane.f32.xlu0 %v225_v20 }
  0x85   : > { %528 = vmax.xlane.f32.xlu1 %v211_v6  ;;  %293 = vadd.xlane.f32.xlu0 %v233_v27 }
  0x89   : > { %558 = vmax.xlane.f32.xlu1 %v226_v23  ;;  %544 = vmax.xlane.f32.xlu0 %v219_v14 }
  0x8d   : > { %295 = vadd.xlane.f32.xlu1 %v234_v28  ;;  %572 = vmax.xlane.f32.xlu0 %v233_v27 }
  0x91   : > { %546 = vmax.xlane.f32.xlu1 %v220_v17  ;;  %530 = vmax.xlane.f32.xlu0 %v212_v9 }
  0x95   : > { %574 = vmax.xlane.f32.xlu1 %v234_v28  ;;  %560 = vmax.xlane.f32.xlu0 %v227_v22 }
  0x99   : > { %297 = vadd.xlane.f32.xlu1 %v235_v29  ;;  %283 = vadd.xlane.f32.xlu0 %v228_v30 }
  0x9d   : > { %548 = vmax.xlane.f32.xlu1 %v221_v16  ;;  %532 = vmax.xlane.f32.xlu0 %v1381_v8 }
  0xa1   : > { %576 = vmax.xlane.f32.xlu1 %v235_v29  ;;  %562 = vmax.xlane.f32.xlu0 %v228_v30 }
  0xa5   : > { %299 = vadd.xlane.f32.xlu1 %v236_v31  ;;  %285 = vadd.xlane.f32.xlu0 %v229_v32 }
  0xa9   : > { %578 = vmax.xlane.f32.xlu1 %v236_v31  ;;  %564 = vmax.xlane.f32.xlu0 %v229_v32 }
  0xad   : > { %580 = vmax.xlane.f32.xlu1 %v237_v33  ;;  %301 = vadd.xlane.f32.xlu0 %v237_v33 }
  0xba   : > { %v244_v40 = vpop.xlane.xlu1 %243  ;;  %v240_v41 = vpop.xlane.xlu0 %239 }
  0xbb   : > { %v340_v52 = vrot.slane %v240_v41, %v1410_v43  ;;  %v352_v56 = vrot.slane %v244_v40, %v1414_v46 }
  0xbe   : > { %v246_v48 = vpop.xlane.xlu1 %245  ;;  %v242_v49 = vpop.xlane.xlu0 %241 }
  0xbf   : > { %v345_v53 = vrot.slane %v242_v49, %v1412_v44  ;;  %v359_v57 = vrot.slane %v246_v48, %v1416_v47 }
  0xc1   : > { %v347_v58 = vsel %vm346_vm1, %v345_v53, %v340_v52 }
  0xc2   : > { %v354_v59 = vsel %vm353_vm2, %v352_v56, %v347_v58  ;;  %v250_v60 = vpop.xlane.xlu1 %249  ;;  %v248_v61 = vpop.xlane.xlu0 %247 }
  0xc3   : > { %v373_v63 = vrot.slane %v250_v60, %v1418_v50  ;;  %v361_v0 = vsel %vm360_vm3, %v359_v57, %v354_v59  ;;  %v366_v1 = vrot.slane %v248_v61, %v1422_v54 }
  0xc5   : > { %v368_v3 = vsel %vm367_vm4, %v366_v1, %v361_v0 }
  0xc6   : > { %v254_v4 = vpop.xlane.xlu1 %253  ;;  %v375_v5 = vsel %vm374_vm5, %v373_v63, %v368_v3  ;;  %v252_v6 = vpop.xlane.xlu0 %251 }
  0xc7   : > { %v387_v7 = vrot.slane %v254_v4, %v1428_v62  ;;  %v380_v8 = vrot.slane %v252_v6, %v1433_v2 }
  0xc9   : > { %v382_v9 = vsel %vm381_vm6, %v380_v8, %v375_v5 }
  0xca   : > { %v389_v10 = vsel %vm388_vm7, %v387_v7, %v382_v9  ;;  %v258_v11 = vpop.xlane.xlu1 %257  ;;  %v256_v12 = vpop.xlane.xlu0 %255 }
  0xcb   : > { %v397_v13 = vrot.slane %v258_v11, %v1412_v44  ;;  %v393_v14 = vrot.slane %v256_v12, %v1410_v43 }
  0xcd   : > { %v398_v15 = vsel %vm346_vm1, %v397_v13, %v393_v14 }
  0xce   : > { %v262_v16 = vpop.xlane.xlu1 %261  ;;  %v260_v17 = vpop.xlane.xlu0 %259 }
  0xcf   : > { %v407_v18 = vrot.slane %v262_v16, %v1416_v47  ;;  %v402_v19 = vrot.slane %v260_v17, %v1414_v46 }
  0xd1   : > { %v403_v20 = vsel %vm353_vm2, %v402_v19, %v398_v15 }
  0xd2   : > { %v266_v21 = vpop.xlane.xlu1 %265  ;;  %v408_v22 = vsel %vm360_vm3, %v407_v18, %v403_v20  ;;  %v264_v23 = vpop.xlane.xlu0 %263 }
  0xd3   : > { %v417_v24 = vrot.slane %v266_v21, %v1418_v50  ;;  %v412_v25 = vrot.slane %v264_v23, %v1422_v54 }
  0xd5   : > { %v413_v26 = vsel %vm367_vm4, %v412_v25, %v408_v22 }
  0xd6   : > { %v270_v27 = vpop.xlane.xlu1 %269  ;;  %v418_v28 = vsel %vm374_vm5, %v417_v24, %v413_v26  ;;  %v268_v29 = vpop.xlane.xlu0 %267 }
  0xd7   : > { %v427_v30 = vrot.slane %v270_v27, %v1428_v62  ;;  %v422_v31 = vrot.slane %v268_v29, %v1433_v2 }
  0xd9   : > { %v423_v32 = vsel %vm381_vm6, %v422_v31, %v418_v28 }
  0xda   : > { %v428_v33 = vsel %vm388_vm7, %v427_v30, %v423_v32  ;;  %v274_v34 = vpop.xlane.xlu1 %273  ;;  %v272_v35 = vpop.xlane.xlu0 %271 }
  0xdb   : > { %v436_v36 = vrot.slane %v274_v34, %v1412_v44  ;;  %v432_v37 = vrot.slane %v272_v35, %v1410_v43  ;;  %v1459_v38 = vsel %vm507_vm8, %v428_v33, %v389_v10 }
  0xdd   : > { %v437_v39 = vsel %vm346_vm1, %v436_v36, %v432_v37 }
  0xde   : > { %v278_v40 = vpop.xlane.xlu1 %277  ;;  %v276_v41 = vpop.xlane.xlu0 %275 }
  0xdf   : > { %v446_v42 = vrot.slane %v278_v40, %v1416_v47  ;;  %v441_v45 = vrot.slane %v276_v41, %v1414_v46 }
  0xe1   : > { %v442_v48 = vsel %vm353_vm2, %v441_v45, %v437_v39 }
  0xe2   : > { %v282_v49 = vpop.xlane.xlu1 %281  ;;  %v447_v51 = vsel %vm360_vm3, %v446_v42, %v442_v48  ;;  %v280_v52 = vpop.xlane.xlu0 %279 }
  0xe3   : > { %v456_v53 = vrot.slane %v282_v49, %v1418_v50  ;;  %v451_v55 = vrot.slane %v280_v52, %v1422_v54 }
  0xe5   : > { %v452_v56 = vsel %vm367_vm4, %v451_v55, %v447_v51 }
  0xe6   : > { %v521_v57 = vpop.xlane.xlu1 %520  ;;  %v519_v58 = vpop.xlane.xlu0 %518  ;;  %v1470_v59 = vsel %vm374_vm5, %v456_v53, %v452_v56 }
  0xe7   : > { %v621_v60 = vrot.slane %v521_v57, %v1412_v44  ;;  %v617_v61 = vrot.slane %v519_v58, %v1410_v43 }
  0xe9   : > { %v622_v63 = vsel %vm346_vm1, %v621_v60, %v617_v61 }
  0xea   : > { %v537_v0 = vpop.xlane.xlu1 %536  ;;  %v535_v1 = vpop.xlane.xlu0 %534 }
  0xeb   : > { %v660_v3 = vrot.slane %v537_v0, %v1412_v44  ;;  %v656_v4 = vrot.slane %v535_v1, %v1410_v43 }
  0xed   : > { %v661_v5 = vsel %vm346_vm1, %v660_v3, %v656_v4 }
  0xee   : > { %v539_v6 = vpop.xlane.xlu1 %538  ;;  %v523_v7 = vpop.xlane.xlu0 %522 }
  0xef   : > { %v665_v8 = vrot.slane %v539_v6, %v1414_v46  ;;  %v626_v9 = vrot.slane %v523_v7, %v1414_v46 }
  0xf1   : > { %v666_v10 = vsel %vm353_vm2, %v665_v8, %v661_v5  ;;  %v627_v11 = vsel %vm353_vm2, %v626_v9, %v622_v63 }
  0xf2   : > { %v553_v12 = vpop.xlane.xlu1 %552  ;;  %v551_v13 = vpop.xlane.xlu0 %550 }
  0xf3   : > { %v699_v4 = vrot.slane %v553_v12, %v1412_v44  ;;  %v695_v7 = vrot.slane %v551_v13, %v1410_v43 }
  0xf5   : > { %v700_v13 = vsel %vm346_vm1, %v699_v4, %v695_v7 }
  0xf6   : > { %v290_v14 = vpop.xlane.xlu1 %289  ;;  %v288_v15 = vpop.xlane.xlu0 %287 }
  0xf7   : > { %v475_v8 = vrot.slane %v290_v14, %v1412_v44  ;;  %v471_v9 = vrot.slane %v288_v15, %v1410_v43 }
  0xf9   : > { %v476_v14 = vsel %vm346_vm1, %v475_v8, %v471_v9 }
  0xfa   : > { %v541_v16 = vpop.xlane.xlu1 %540  ;;  %v525_v17 = vpop.xlane.xlu0 %524 }
  0xfb   : > { %v670_v36 = vrot.slane %v541_v16, %v1416_v47  ;;  %v631_v37 = vrot.slane %v525_v17, %v1416_v47 }
  0xfd   : > { %v671_v52 = vsel %vm360_vm3, %v670_v36, %v666_v10  ;;  %v632_v53 = vsel %vm360_vm3, %v631_v37, %v627_v11 }
  0xfe   : > { %v1482_v18 = vpop.xlane.xlu1 %566  ;;  %v555_v19 = vpop.xlane.xlu0 %554 }
  0xff   : > { %v704_v17 = vrot.slane %v555_v19, %v1414_v46  ;;  %v734_v15 = vrot.slane %v1482_v18, %v1410_v43 }
 0x102   : > { %v292_v20 = vpop.xlane.xlu1 %291  ;;  %v1484_v21 = vpop.xlane.xlu0 %568 }
 0x103   : > { %v738_v12 = vrot.slane %v1484_v21, %v1412_v44 }
 0x106   : > { %v543_v22 = vpop.xlane.xlu1 %542  ;;  %v527_v23 = vpop.xlane.xlu0 %526 }
 0x107   : > { %v675_v39 = vrot.slane %v543_v22, %v1422_v54  ;;  %v636_v40 = vrot.slane %v527_v23, %v1422_v54  ;;  %v480_v22 = vrot.slane %v292_v20, %v1414_v46  ;;  %v705_v20 = vsel %vm353_vm2, %v704_v17, %v700_v13 }
 0x109   : > { %v676_v55 = vsel %vm367_vm4, %v675_v39, %v671_v52  ;;  %v637_v56 = vsel %vm367_vm4, %v636_v40, %v632_v53 }
 0x10a   : > { %v1486_v24 = vpop.xlane.xlu1 %570  ;;  %v1488_v25 = vpop.xlane.xlu0 %556 }
 0x10b   : > { %v743_v36 = vrot.slane %v1486_v24, %v1414_v46 }
 0x10e   : > { %v529_v26 = vpop.xlane.xlu1 %528  ;;  %v1490_v27 = vpop.xlane.xlu0 %293 }
 0x10f   : > { %v641_v45 = vrot.slane %v529_v26, %v1418_v50  ;;  %v709_v26 = vrot.slane %v1488_v25, %v1416_v47  ;;  %v485_v25 = vrot.slane %v1490_v27, %v1416_v47 }
 0x111   : > { %v642_v60 = vsel %vm374_vm5, %v641_v45, %v637_v56  ;;  %v710_v40 = vsel %vm360_vm3, %v709_v26, %v705_v20 }
 0x112   : > { %v1492_v28 = vpop.xlane.xlu1 %558  ;;  %v545_v29 = vpop.xlane.xlu0 %544 }
 0x113   : > { %v680_v48 = vrot.slane %v545_v29, %v1418_v50  ;;  %v714_v44 = vrot.slane %v1492_v28, %v1422_v54 }
 0x115   : > { %v681_v61 = vsel %vm374_vm5, %v680_v48, %v676_v55 }
 0x116   : > { %v1494_v30 = vpop.xlane.xlu1 %295  ;;  %v1496_v31 = vpop.xlane.xlu0 %572 }
 0x117   : > { %v748_v37 = vrot.slane %v1496_v31, %v1416_v47  ;;  %v490_v46 = vrot.slane %v1494_v30, %v1422_v54 }
 0x11a   : > { %v547_v32 = vpop.xlane.xlu1 %546  ;;  %v531_v33 = vpop.xlane.xlu0 %530 }
 0x11b   : > { %v685_v49 = vrot.slane %v547_v32, %v1433_v2  ;;  %v646_v51 = vrot.slane %v531_v33, %v1433_v2  ;;  %v481_v32 = vsel %vm353_vm2, %v480_v22, %v476_v14  ;;  %v739_v33 = vsel %vm346_vm1, %v738_v12, %v734_v15 }
 0x11c   : > { %v744_v48 = vsel %vm353_vm2, %v743_v36, %v739_v33 }
 0x11d   : > { %v686_v1 = vsel %vm381_vm6, %v685_v49, %v681_v61  ;;  %v647_v3 = vsel %vm381_vm6, %v646_v51, %v642_v60  ;;  %v749_v49 = vsel %vm360_vm3, %v748_v37, %v744_v48 }
 0x11e   : > { %v1498_v34 = vpop.xlane.xlu1 %574  ;;  %v1500_v35 = vpop.xlane.xlu0 %560 }
 0x11f   : > { %v719_v43 = vrot.slane %v1500_v35, %v1418_v50  ;;  %v753_v24 = vrot.slane %v1498_v34, %v1422_v54 }
 0x122   : > { %v1506_v41 = vpop.xlane.xlu1 %297  ;;  %v284_v42 = vpop.xlane.xlu0 %283 }
 0x123   : > { %v461_v23 = vrot.slane %v284_v42, %v1433_v2  ;;  %v715_v42 = vsel %vm367_vm4, %v714_v44, %v710_v40  ;;  %v495_v47 = vrot.slane %v1506_v41, %v1418_v50 }
 0x124   : > { %v720_v30 = vsel %vm374_vm5, %v719_v43, %v715_v42 }
 0x125   : > { %v462_v18 = vsel %vm381_vm6, %v461_v23, %v1470_v59 }
 0x126   : > { %v549_v57 = vpop.xlane.xlu1 %548  ;;  %v533_v58 = vpop.xlane.xlu0 %532 }
 0x127   : > { %v690_v63 = vrot.slane %v549_v57, %v1428_v62  ;;  %v651_v0 = vrot.slane %v533_v58, %v1428_v62 }
 0x129   : > { %v691_v5 = vsel %vm388_vm7, %v690_v63, %v686_v1  ;;  %v652_v6 = vsel %vm388_vm7, %v651_v0, %v647_v3  ;;  %v517_v63 = vld [vmem:[#allocation3] sm:$0xf]  ;;  %v238_v0 = vld [vmem:[#allocation2] sm:$0xf] }
 0x12a   : > { %v770_v10 = vsel %vm507_vm8, %v691_v5, %v652_v6  ;;  %v577_v11 = vpop.xlane.xlu1 %576  ;;  %v563_v16 = vpop.xlane.xlu0 %562 }
 0x12b   : > { %v724_v28 = vrot.slane %v563_v16, %v1433_v2  ;;  %v758_v31 = vrot.slane %v577_v11, %v1418_v50  ;;  %v754_v50 = vsel %vm367_vm4, %v753_v24, %v749_v49 }
 0x12d   : > { %v725_v51 = vsel %vm381_vm6, %v724_v28, %v720_v30  ;;  %v759_v57 = vsel %vm374_vm5, %v758_v31, %v754_v50 }
 0x12e   : > { %v300_v29 = vpop.xlane.xlu1 %299  ;;  %v286_v19 = vpop.xlane.xlu0 %285 }
 0x12f   : > { %v466_v21 = vrot.slane %v286_v19, %v1428_v62  ;;  %v500_v54 = vrot.slane %v300_v29, %v1433_v2 }
 0x131   : > { %v467_v39 = vsel %vm388_vm7, %v466_v21, %v462_v18 }
 0x132   : > { %v510_v59 = vsel %vm509_vm9, %v467_v39, %v1459_v38  ;;  %v579_v35 = vpop.xlane.xlu1 %578  ;;  %v565_v27 = vpop.xlane.xlu0 %564  ;;  %v486_v38 = vsel %vm360_vm3, %v485_v25, %v481_v32 }
 0x133   : > { %v729_v45 = vrot.slane %v565_v27, %v1428_v62  ;;  %v763_v34 = vrot.slane %v579_v35, %v1433_v2  ;;  %v491_v41 = vsel %vm367_vm4, %v490_v46, %v486_v38 }
 0x134   : > { %v496_v56 = vsel %vm374_vm5, %v495_v47, %v491_v41 }
 0x135   : > { %v730_v52 = vsel %vm388_vm7, %v729_v45, %v725_v51  ;;  %v501_v60 = vsel %vm381_vm6, %v500_v54, %v496_v56  ;;  %v764_v61 = vsel %vm381_vm6, %v763_v34, %v759_v57 }
 0x136   : > { %v581_v53 = vpop.xlane.xlu1 %580  ;;  %v302_v55 = vpop.xlane.xlu0 %301  ;;  %v771_v1 = vsel %vm509_vm9, %v730_v52, %v770_v10 }
 0x137   : > { %v768_v2 = vrot.slane %v581_v53, %v1428_v62  ;;  %v505_v58 = vrot.slane %v302_v55, %v1428_v62 }
 0x139   : > { %v769_v3 = vsel %vm388_vm7, %v768_v2, %v764_v61  ;;  %v506_v4 = vsel %vm388_vm7, %v505_v58, %v501_v60  ;;  %779 = sbr.rel (%p1040_p7) target bundleno = 760 (0x2f8), region = 44 }
 0x13a   : > { %v772_v5 = vsel %vm511_vm10, %v769_v3, %v771_v1  ;;  %v512_v6 = vsel %vm511_vm10, %v506_v4, %v510_v59 }
 0x13b   : > { %v774_v7 = vmax.f32 %v517_v63, %v772_v5  ;;  %v514_v8 = vadd.f32 %v512_v6, %v238_v0 }
 0x13d   : > { %775 = vst.msk [vmem:[#allocation3] sm:$0xf] %vm515_vm11, %v774_v7  ;;  %516 = vst.msk [vmem:[#allocation2] sm:$0xf] %vm515_vm11, %v514_v8 }
 0x13e   : > { %v790_v62 = vld [vmem:[%s1658_s1 + $0x38] sm:$0xff]  ;;  %v1271_v9 = vmov 0.0   ;;  %v789_v10 = vld [vmem:[%s1658_s1 + $0x30] sm:$0xff]  ;;  %vm1272_vm12 = vmmov 0   ;;  %v788_v11 = vld [vmem:[%s1658_s1 + $0x28] sm:$0xff]  ;;  %vm795_vm13 = vcmask 1043456  }
 0x13f   : > { %1060 = vmatprep.subr.mxu0 %v1271_v9  ;;  %1076 = vmatprep.mubr.msk.f32.mxu0 %vm1272_vm12, %v1271_v9  ;;  %v787_v16 = vld [vmem:[%s1658_s1 + $0x20] sm:$0xff]  ;;  %v786_v17 = vld [vmem:[%s1658_s1 + $0x18] sm:$0xff]  ;;  %v785_v23 = vld [vmem:[%s1658_s1 + $0x10] sm:$0xff]  ;;  %vm797_vm14 = vcmask 523264   ;;  %vm872_vm15 = vcmask 31744  }
 0x140   : > { %1061 = vmatpush3.msra.mxu0 %v790_v62  ;;  %1079 = vmatprep.subr.mxu1 %v1271_v9  ;;  %v784_v15 = vld [vmem:[%s1658_s1 + $0x8] sm:$0xff]  ;;  %v783_v26 = vld [vmem:[%s1658_s1] sm:$0xff] }
 0x141   : > { %1062 = vmatprep.subr.mxu0 %v1271_v9  ;;  %1081 = vmatprep.mubr.msk.f32.mxu1 %vm1272_vm12, %v1271_v9  ;;  %v791_v19 = vld [vmem:[%s1659_s2] sm:$0xf] }
 0x142   : > { %1063 = vmatpush3.msra.mxu0 %v789_v10  ;;  %1080 = vmatpush3.msk.msra.mxu1 %vm795_vm13, %v791_v19 }
 0x143   : > { %1064 = vmatprep.subr.mxu0 %v1271_v9 }
 0x144   : > { %1065 = vmatpush3.msra.mxu0 %v788_v11  ;;  %v780_v22 = vld [vmem:[#allocation2] sm:$0xf]  ;;  %v782_v12 = vld [vmem:[#allocation3] sm:$0xf] }
 0x145   : > { %1066 = vmatprep.subr.mxu0 %v1271_v9  ;;  %v781_v13 = vmul.f32 0.00390625, %v780_v22  ;;  %v793_v14 = vrot.slane %v782_v12, 4 }
 0x146   : > { %1067 = vmatpush3.msra.mxu0 %v787_v16 }
 0x147   : > { %1068 = vmatprep.subr.mxu0 %v1271_v9  ;;  %v796_v29 = vsel %vm795_vm13, %v781_v13, %v793_v14 }
 0x148   : > { %1069 = vmatpush3.msra.mxu0 %v786_v17 }
 0x149   : > { %1070 = vmatprep.subr.mxu0 %v1271_v9 }
 0x14a   : > { %1071 = vmatpush3.msra.mxu0 %v785_v23 }
 0x14b   : > { %1072 = vmatprep.subr.mxu0 %v1271_v9 }
 0x14c   : > { %1073 = vmatpush3.msra.mxu0 %v784_v15 }
 0x14d   : > { %1074 = vmatprep.subr.mxu0 %v1271_v9 }
 0x14e   : > { %1075 = vmatpush3.msra.mxu0 %v783_v26 }
 0x14f   : > { %1077 = vmatmul.mubr.msk.f32.vlgmr.msra.gmra.mxu0 %vm797_vm14, %v796_v29 }
 0x20f   : > { %v867_v20 = vpop.f32.mrf.mxu0 }
 0x210   : > { %v871_v32 = vmax.f32 %v867_v20, 0.0 }
 0x211   : > { %v1078_v44 = vpop.f32.mrf.mxu0 }
 0x212   : > { %1082 = vmatmul.mubr.msk.f32.vlgmr.msra.gmra.mxu1 %vm872_vm15, %v871_v32 }
 0x2d2   : > { %v945_v21 = vpop.f32.mrf.mxu1 }
 0x2d3   : > { %v950_v33 = vrot.slane %v945_v21, 4 }
 0x2d4   : > { %v1083_v36 = vpop.f32.mrf.mxu1 }
 0x2d5   : > { %v952_v43 = vadd.f32 %v950_v33, %v945_v21 }
 0x2d7   : > { %v1044_v18 = vmul.f32 -1.442695, %v952_v43 }
 0x2d9   : > { %1153 = vpow2.f32 %v1044_v18 }
 0x2e6   : > { %v1154_v25 = vpop.eup %1153 }
 0x2e7   : > { %v956_v37 = vadd.f32 1.0, %v1154_v25 }
 0x2e9   : > { %1155 = vrcp.f32 %v956_v37 }
 0x2f6   : > { %v1156_v28 = vpop.eup %1155 }
 0x2f7   : > { %959 = vst.msk [vmem:[#allocation7] sm:$0xf] %vm515_vm11, %v1156_v28 }
 0x2f8 PF: > { %p1624_p9 = scmp.eq.s32.totalorder %s1032_s18, 1  ;;  %s1273_s27 = smov [#allocation7]  }
 0x2f9   : > { %s969_s23 = sshll.u32 %s1273_s27, 4  ;;  %s970_s23 = int_to_ptr.vmem [resolvable:$true] %s969_s23 }
 0x2fa   : > { %s1185_s28 = scalar_lea.vmem %s970_s23, 64  ;;  %p1192_p13 = scmp.lt.s32.totalorder %s970_s23, %s970_s23 }
 0x2fb   : > { %p1186_p10 = scmp.ne.s32.totalorder %s970_s23, %s1185_s28  ;;  %p1193_p0 = scmp.lt.s32.totalorder %s1185_s28, %s1185_s28 }
 0x2fd   : > { %p1187_p11 = pnand %p1186_p10, %p1624_p9  ;;  %p1194_p1 = por %p1193_p0, %p1192_p13 }
 0x2ff   : > { %p1188_p12 = pneg %p1187_p11 }
 0x301   : > { %p1195_p2 = pnand %p1194_p1, %p1188_p12 }
 0x303   : > { %1198 = shalt.err (!%p1195_p2)
}
 0x304   : > { %1087 = dma.vmem_to_hbm [thread:$0]  (%p1624_p9), %s970_s23, 64, %s1660_s3, [#allocation6]  }
 0x305   : > { %1238 = dma.done.wait (%p1624_p9), [#allocation6], 64  }
 0x306   : > { %1240 = vsyncadd (%p1624_p9), [#allocation6], 4294967232 }
 0x307 PF: > { %s17_s17 = sadd.s32 1, %s1263_s17   ;;  %s1665_s12 = smov %s1247_s13 }
 0x308   : > { %p14_p3 = scmp.ge.s32.totalorder %s17_s17, 4   ;;  %s1666_s13 = smov %s1251_s14 }
 0x309   : > { %s1667_s14 = smov %s1345_s24  ;;  %s1668_s15 = smov %s1259_s16 }
 0x30a   : > { %s1669_s16 = smov %s1671_s19  ;;  %16 = sbr.rel (!%p14_p3) target bundleno = 5 (0x5), region = 78 }
 0x30f   :  { %982 = vsyncpa [#allocation5], 1 }
 0x310   :  { %984 = vsyncpa [#allocation5 + $0x1], 1 }
 0x311   :  { %985 = vsyncpa [#allocation6], 1 }
 0x312   :  { %987 = vsyncpa [#allocation6 + $0x1], 1 }

</bundles_post_ra>
